<compile_context>
chip_gen: v7x
topology: tpu7x:2x2x1
jax: 0.10.0
libtpu: 0.0.40
codegen_flags: <defaults>
</compile_context>

<pallas_src>
import functools

import jax
import jax.numpy as jnp
from jax.experimental import pallas as pl
from jax.experimental.pallas import tpu as pltpu


def _kl_loss_kernel(temp_ref, student_ref, teacher_ref, out_ref, acc_ref, *,
                    global_batch: int, block_rows: int, steps_per_slice: int,
                    needs_row_mask: bool, approx_log_q: bool):
    c = pl.program_id(0)                 # parallel axis (sharded across TCs on v7x)
    i = pl.program_id(1)                 # sequential reduction axis
    last = pl.num_programs(1) - 1

    @pl.when(i == 0)
    def _init():
        acc_ref[...] = jnp.zeros_like(acc_ref)

    T = temp_ref[0, 0]
    inv_T = 1.0 / T  # fold the two '/ T' into multiplies

    # --- Teacher branch first: only q and log_q stay live afterwards --------
    t = teacher_ref[...].astype(jnp.float32) * inv_T
    t_max = jnp.max(t, axis=1, keepdims=True)
    t_shift = t - t_max
    t_exp = jnp.exp(t_shift)
    t_sum = jnp.sum(t_exp, axis=1, keepdims=True)
    # One exact reciprocal per row (approx=True would break 1e-5 parity).
    inv_t_sum = pl.reciprocal(t_sum, approx=False)
    q = t_exp * inv_t_sum + jnp.float32(1e-7)
    if approx_log_q:
        # Analytic log-softmax: saves one EUP log per element (EUP is the
        # binding slot on v7x / bf16-v6e) but drops the +1e-7 from inside the
        # log -> deviates from PyTorch by up to ~1e-7-weighted terms.
        log_q = t_shift - jnp.log(t_sum)
    else:
        log_q = jnp.log(q)

    # --- Student branch: numerically stable log_softmax ---------------------
    s = student_ref[...].astype(jnp.float32) * inv_T
    s_max = jnp.max(s, axis=1, keepdims=True)
    s_shift = s - s_max
    log_p = s_shift - jnp.log(jnp.sum(jnp.exp(s_shift), axis=1, keepdims=True))

    # Lane-dim reduce lands on the XLU slot (otherwise idle here); only a
    # (block_rows, 1) partial survives into the accumulator.
    row_kl = jnp.sum(q * (log_q - log_p), axis=1, keepdims=True)

    if needs_row_mask:
        # Last row block may extend past the real batch; padded rows hold
        # undefined data, but everything above is per-row, so NaN/Inf stay
        # confined to those rows and the select below discards them.
        # (Do NOT reduce across rows before this mask.)
        block_idx = c * steps_per_slice + i
        rows = block_idx * block_rows + jax.lax.broadcasted_iota(
            jnp.int32, (block_rows, 1), 0)
        row_kl = jnp.where(rows < global_batch, row_kl, jnp.float32(0.0))

    acc_ref[...] += row_kl

    @pl.when(i == last)
    def _finalize():
        partial = (T * T) * jnp.sum(acc_ref[...]) / jnp.float32(global_batch)
        sub = jax.lax.broadcasted_iota(jnp.int32, (1, 8, 128), 1)
        lane = jax.lax.broadcasted_iota(jnp.int32, (1, 8, 128), 2)
        # One scaled partial per slice at [c, 0, 0]; zeros elsewhere.
        out_ref[...] = jnp.where((sub == 0) & (lane == 0), partial,
                                 jnp.float32(0.0))


def _tpu_vmem_budget() -> tuple[int, int]:
    """(input tile budget, vmem_limit_bytes) per TPU generation."""
    cap = 0
    try:
        info = pltpu.get_tpu_info()
        cap = int(getattr(info, "vmem_capacity_bytes", 0) or 0)
    except Exception:
        cap = 0
    if cap >= 96 * 1024 * 1024:
        # v5e / v6e: 128 MiB physical VMEM -> large tiles, raised scoped limit.
        return 20 * 1024 * 1024, 64 * 1024 * 1024
    # v7x (64 MiB physical) or unknown: conservative.
    return 10 * 1024 * 1024, 32 * 1024 * 1024


def _choose_block_rows(batch: int, num_classes: int, itemsize: int,
                       input_budget_bytes: int) -> int:
    """Pick a row-tile size that fits the per-generation VMEM budget."""
    # Per step, per row:
    #   2 inputs x 2 pipeline buffers (input dtype)            -> 4*itemsize*C
    #   ~4 f32 (rows, C) intermediates (exp/shift/q/log_q that
    #   can't fuse across the per-row reduction barriers)       -> 16*C
    # The (rows, 1) accumulator is negligible.
    bytes_per_row = num_classes * (4 * itemsize + 16)
    tb = (input_budget_bytes // max(bytes_per_row, 1)) // 8 * 8
    tb = max(8, min(2048, tb))
    if batch <= tb:
        return batch  # single row-block; full-dim block is always legal
    return tb         # multiple of 8; ragged last block is masked in-kernel


def kl_loss(output_batch: jax.Array, teacher_outputs: jax.Array,
            temperature=1.0, *, block_rows: int | None = None,
            approx_log_q: bool = False) -> jax.Array:
    """Pallas implementation of KL_Loss.forward. Inputs: [B, C] logits."""
    assert output_batch.shape == teacher_outputs.shape
    assert output_batch.ndim == 2
    B, C = output_batch.shape

    input_budget, vmem_limit = _tpu_vmem_budget()
    if block_rows is None:
        block_rows = _choose_block_rows(
            B, C, jnp.dtype(output_batch.dtype).itemsize, input_budget)
    block_rows = min(block_rows, B)
    assert block_rows == B or block_rows % 8 == 0, \
        "block_rows must equal B or be a multiple of 8"

    total_blocks = pl.cdiv(B, block_rows)
    # Split the row blocks over two parallel grid slices when it divides
    # evenly: on v7x the "parallel" axis shards across the 2 TensorCores;
    # on single-TC chips it is just an outer serial loop.
    num_slices = 2 if (total_blocks >= 2 and total_blocks % 2 == 0) else 1
    steps = total_blocks // num_slices
    needs_row_mask = (B % block_rows) != 0

    kernel = functools.partial(
        _kl_loss_kernel,
        global_batch=B,
        block_rows=block_rows,
        steps_per_slice=steps,
        needs_row_mask=needs_row_mask,
        approx_log_q=approx_log_q,
    )

    # Temperature as a (1,1) SMEM scalar: no recompile across T sweeps.
    temp = jnp.asarray(temperature, jnp.float32).reshape(1, 1)

    in_row_map = lambda c, i, s=steps: (c * s + i, 0)

    out = pl.pallas_call(
        kernel,
        out_shape=jax.ShapeDtypeStruct((num_slices, 8, 128), jnp.float32),
        grid_spec=pltpu.PrefetchScalarGridSpec(
            num_scalar_prefetch=0,
            grid=(num_slices, steps),
            in_specs=[
                pl.BlockSpec(memory_space=pltpu.SMEM),            # temperature
                pl.BlockSpec((block_rows, C), in_row_map),        # student tile
                pl.BlockSpec((block_rows, C), in_row_map),        # teacher tile
            ],
            out_specs=pl.BlockSpec((1, 8, 128), lambda c, i: (c, 0, 0)),
            scratch_shapes=[pltpu.VMEM((block_rows, 1), jnp.float32)],
        ),
        compiler_params=pltpu.CompilerParams(
            # Rows sharded across cores on the leading axis; accumulator is
            # carried across the trailing (reduction) axis -> sequential.
            dimension_semantics=("parallel", "arbitrary"),
            vmem_limit_bytes=vmem_limit,
        ),
    )(temp, output_batch, teacher_outputs)

    # Each slice contributed one nonzero scaled partial; sum them.
    return jnp.sum(out)


def _kl_loss_ref(output_batch, teacher_outputs, temperature=1.0):
    """Pure-JAX reference matching the PyTorch module."""
    T = temperature
    log_p = jax.nn.log_softmax(output_batch / T, axis=1)
    q = jax.nn.softmax(teacher_outputs / T, axis=1) + 1e-7
    B = output_batch.shape[0]
    return (T * T) * jnp.sum(q * (jnp.log(q) - log_p)) / B


if __name__ == "__main__":
    key = jax.random.PRNGKey(0)
    k1, k2, k3, k4 = jax.random.split(key, 4)
    temperature = 3.0

    # Case 1: B divisible by block_rows -> 2 row-blocks -> 2 parallel slices
    # (exercises the megacore-style output partials).
    B1, C1 = 16, 10
    s1 = jax.random.normal(k1, (B1, C1), dtype=jnp.float32)
    t1 = jax.random.normal(k2, (B1, C1), dtype=jnp.float32)
    got1 = jax.block_until_ready(kl_loss(s1, t1, temperature, block_rows=8))
    ref1 = _kl_loss_ref(s1, t1, temperature)
    assert jnp.allclose(got1, ref1, rtol=1e-5, atol=1e-5), (got1, ref1)

    # Case 2: ragged batch (B % block_rows != 0) and C not a multiple of 128,
    # exercising the (rows,1) row mask, odd block count (single slice), and
    # full-C lane blocks.
    B2, C2 = 20, 130
    s2 = jax.random.normal(k3, (B2, C2), dtype=jnp.float32)
    t2 = jax.random.normal(k4, (B2, C2), dtype=jnp.float32)
    got2 = jax.block_until_ready(kl_loss(s2, t2, temperature, block_rows=8))
    ref2 = _kl_loss_ref(s2, t2, temperature)
    assert jnp.allclose(got2, ref2, rtol=1e-5, atol=1e-5), (got2, ref2)

    # Case 3: auto block size -> single full-batch block, grid (1, 1).
    got3 = jax.block_until_ready(kl_loss(s1, t1, temperature))
    assert jnp.allclose(got3, ref1, rtol=1e-5, atol=1e-5), (got3, ref1)

    print("KERNEL_OK")
</pallas_src>

<mosaic_0001>
module attributes {stable_mosaic.version = 11 : i64} {
  func.func @_kl_loss_kernel(%arg0: i32, %arg1: i32, %arg2: memref<1x1xf32, #tpu.memory_space<smem>>, %arg3: memref<8x10xf32, #tpu.memory_space<vmem>>, %arg4: memref<8x10xf32, #tpu.memory_space<vmem>>, %arg5: memref<1x8x128xf32, #tpu.memory_space<vmem>>, %arg6: memref<8x1xf32, #tpu.memory_space<vmem>>) attributes {dimension_semantics = [#tpu.dimension_semantics<parallel>, #tpu.dimension_semantics<arbitrary>], iteration_bounds = array<i64: 2, 1>, scalar_prefetch = 0 : i64, scratch_operands = 1 : i64, tpu.core_type = #tpu.core_type<tc>, window_params = [{transform_indices = @transform_0, window_bounds = array<i64: 1, 1>}, {transform_indices = @transform_1, window_bounds = array<i64: 8, 10>}, {transform_indices = @transform_2, window_bounds = array<i64: 8, 10>}, {transform_indices = @transform_3, window_bounds = array<i64: 1, 8, 128>}]} {
    %c0_i32 = arith.constant 0 : i32
    %0 = arith.cmpi eq, %arg1, %c0_i32 : i32
    %1 = arith.extui %0 : i1 to i32
    %c0_i32_0 = arith.constant 0 : i32
    %2 = arith.cmpi ne, %1, %c0_i32_0 : i32
    scf.if %2 {
      %cst_18 = arith.constant 0.000000e+00 : f32
      %44 = vector.broadcast %cst_18 : f32 to vector<8x1xf32>
      %c0_19 = arith.constant 0 : index
      %c0_20 = arith.constant 0 : index
      %45 = vector.load %arg6[%c0_19, %c0_20] : memref<8x1xf32, #tpu.memory_space<vmem>>, vector<8x1xf32>
      tpu.vector_store %arg6[%c0_19, %c0_20], %44 {strides = array<i32>} : memref<8x1xf32, #tpu.memory_space<vmem>>, vector<8x1xf32>,
    } else {
    }
    %c0 = arith.constant 0 : index
    %c0_1 = arith.constant 0 : index
    %3 = memref.load %arg2[%c0, %c0_1] : memref<1x1xf32, #tpu.memory_space<smem>>
    %cst = arith.constant 1.000000e+00 : f32
    %4 = arith.divf %cst, %3 : f32
    %c0_2 = arith.constant 0 : index
    %c0_3 = arith.constant 0 : index
    %5 = vector.load %arg4[%c0_2, %c0_3] : memref<8x10xf32, #tpu.memory_space<vmem>>, vector<8x10xf32>
    %6 = vector.broadcast %4 : f32 to vector<8x10xf32>
    %7 = arith.mulf %5, %6 : vector<8x10xf32>
    %cst_4 = arith.constant dense<0xFF800000> : vector<8xf32>
    %8 = vector.multi_reduction <maximumf>, %7, %cst_4 [1] : vector<8x10xf32> to vector<8xf32>
    %9 = vector.shape_cast %8 : vector<8xf32> to vector<8x1xf32>
    %10 = vector.broadcast %9 : vector<8x1xf32> to vector<8x10xf32>
    %11 = arith.subf %7, %10 : vector<8x10xf32>
    %12 = math.exp %11 : vector<8x10xf32>
    %cst_5 = arith.constant dense<0.000000e+00> : vector<8xf32>
    %13 = vector.multi_reduction <add>, %12, %cst_5 [1] : vector<8x10xf32> to vector<8xf32>
    %14 = vector.shape_cast %13 : vector<8xf32> to vector<8x1xf32>
    %15 = tpu.reciprocal %14 : vector<8x1xf32> -> vector<8x1xf32>
    %16 = vector.broadcast %15 : vector<8x1xf32> to vector<8x10xf32>
    %17 = arith.mulf %12, %16 : vector<8x10xf32>
    %cst_6 = arith.constant 1.000000e-07 : f32
    %18 = vector.broadcast %cst_6 : f32 to vector<8x10xf32>
    %19 = arith.addf %17, %18 : vector<8x10xf32>
    %20 = math.log %19 : vector<8x10xf32>
    %c0_7 = arith.constant 0 : index
    %c0_8 = arith.constant 0 : index
    %21 = vector.load %arg3[%c0_7, %c0_8] : memref<8x10xf32, #tpu.memory_space<vmem>>, vector<8x10xf32>
    %22 = vector.broadcast %4 : f32 to vector<8x10xf32>
    %23 = arith.mulf %21, %22 : vector<8x10xf32>
    %cst_9 = arith.constant dense<0xFF800000> : vector<8xf32>
    %24 = vector.multi_reduction <maximumf>, %23, %cst_9 [1] : vector<8x10xf32> to vector<8xf32>
    %25 = vector.shape_cast %24 : vector<8xf32> to vector<8x1xf32>
    %26 = vector.broadcast %25 : vector<8x1xf32> to vector<8x10xf32>
    %27 = arith.subf %23, %26 : vector<8x10xf32>
    %28 = math.exp %27 : vector<8x10xf32>
    %cst_10 = arith.constant dense<0.000000e+00> : vector<8xf32>
    %29 = vector.multi_reduction <add>, %28, %cst_10 [1] : vector<8x10xf32> to vector<8xf32>
    %30 = vector.shape_cast %29 : vector<8xf32> to vector<8x1xf32>
    %31 = math.log %30 : vector<8x1xf32>
    %32 = vector.broadcast %31 : vector<8x1xf32> to vector<8x10xf32>
    %33 = arith.subf %27, %32 : vector<8x10xf32>
    %34 = arith.subf %20, %33 : vector<8x10xf32>
    %35 = arith.mulf %19, %34 : vector<8x10xf32>
    %cst_11 = arith.constant dense<0.000000e+00> : vector<8xf32>
    %36 = vector.multi_reduction <add>, %35, %cst_11 [1] : vector<8x10xf32> to vector<8xf32>
    %37 = vector.shape_cast %36 : vector<8xf32> to vector<8x1xf32>
    %c0_12 = arith.constant 0 : index
    %c0_13 = arith.constant 0 : index
    %38 = vector.load %arg6[%c0_12, %c0_13] : memref<8x1xf32, #tpu.memory_space<vmem>>, vector<8x1xf32>
    %39 = arith.addf %38, %37 : vector<8x1xf32>
    %c0_14 = arith.constant 0 : index
    %c0_15 = arith.constant 0 : index
    %40 = vector.load %arg6[%c0_14, %c0_15] : memref<8x1xf32, #tpu.memory_space<vmem>>, vector<8x1xf32>
    tpu.vector_store %arg6[%c0_14, %c0_15], %39 {strides = array<i32>} : memref<8x1xf32, #tpu.memory_space<vmem>>, vector<8x1xf32>,
    %c0_i32_16 = arith.constant 0 : i32
    %41 = arith.cmpi eq, %arg1, %c0_i32_16 : i32
    %42 = arith.extui %41 : i1 to i32
    %c0_i32_17 = arith.constant 0 : i32
    %43 = arith.cmpi ne, %42, %c0_i32_17 : i32
    scf.if %43 {
      %44 = arith.mulf %3, %3 : f32
      %c0_18 = arith.constant 0 : index
      %c0_19 = arith.constant 0 : index
      %45 = vector.load %arg6[%c0_18, %c0_19] : memref<8x1xf32, #tpu.memory_space<vmem>>, vector<8x1xf32>
      %46 = vector.shape_cast %45 : vector<8x1xf32> to vector<1x8x1xf32>
      %cst_20 = arith.constant dense<0.000000e+00> : vector<1xf32>
      %47 = vector.multi_reduction <add>, %46, %cst_20 [1, 2] : vector<1x8x1xf32> to vector<1xf32>
      %48 = vector.shape_cast %47 : vector<1xf32> to vector<1x1x1xf32>
      %49 = vector.extract %48[0, 0, 0] : f32 from vector<1x1x1xf32>
      %50 = arith.mulf %44, %49 : f32
      %cst_21 = arith.constant 1.600000e+01 : f32
      %51 = arith.divf %50, %cst_21 : f32
      %52 = tpu.iota {dimensions = array<i32: 1>} : vector<1x8x128xi32>
      %53 = tpu.iota {dimensions = array<i32: 2>} : vector<1x8x128xi32>
      %c0_i32_22 = arith.constant 0 : i32
      %54 = vector.broadcast %c0_i32_22 : i32 to vector<1x8x128xi32>
      %55 = arith.cmpi eq, %52, %54 : vector<1x8x128xi32>
      %c0_i32_23 = arith.constant 0 : i32
      %56 = vector.broadcast %c0_i32_23 : i32 to vector<1x8x128xi32>
      %57 = arith.cmpi eq, %53, %56 : vector<1x8x128xi32>
      %58 = arith.andi %55, %57 : vector<1x8x128xi1>
      %cst_24 = arith.constant 0.000000e+00 : f32
      %59 = vector.broadcast %51 : f32 to vector<1x8x128xf32>
      %60 = vector.broadcast %cst_24 : f32 to vector<1x8x128xf32>
      %61 = arith.select %58, %59, %60 : vector<1x8x128xi1>, vector<1x8x128xf32>
      %c0_25 = arith.constant 0 : index
      %c0_26 = arith.constant 0 : index
      %c0_27 = arith.constant 0 : index
      %62 = vector.load %arg5[%c0_25, %c0_26, %c0_27] : memref<1x8x128xf32, #tpu.memory_space<vmem>>, vector<1x8x128xf32>
      tpu.vector_store %arg5[%c0_25, %c0_26, %c0_27], %61 {strides = array<i32>} : memref<1x8x128xf32, #tpu.memory_space<vmem>>, vector<1x8x128xf32>,
    } else {
    }
    return
  }
  func.func @transform_0(%arg0: i32, %arg1: i32) -> (i32, i32) {
    %c0_i32 = arith.constant 0 : i32
    %c0_i32_0 = arith.constant 0 : i32
    %c0_i32_1 = arith.constant 0 : i32
    return %c0_i32, %c0_i32_0 : i32, i32
  }
  func.func @transform_1(%arg0: i32, %arg1: i32) -> (i32, i32) {
    %c1_i32 = arith.constant 1 : i32
    %0 = arith.muli %arg0, %c1_i32 : i32
    %1 = arith.addi %0, %arg1 : i32
    %c0_i32 = arith.constant 0 : i32
    %c0_i32_0 = arith.constant 0 : i32
    return %1, %c0_i32 : i32, i32
  }
  func.func @transform_2(%arg0: i32, %arg1: i32) -> (i32, i32) {
    %c1_i32 = arith.constant 1 : i32
    %0 = arith.muli %arg0, %c1_i32 : i32
    %1 = arith.addi %0, %arg1 : i32
    %c0_i32 = arith.constant 0 : i32
    %c0_i32_0 = arith.constant 0 : i32
    return %1, %c0_i32 : i32, i32
  }
  func.func @transform_3(%arg0: i32, %arg1: i32) -> (i32, i32, i32) {
    %c0_i32 = arith.constant 0 : i32
    %c0_i32_0 = arith.constant 0 : i32
    %c0_i32_1 = arith.constant 0 : i32
    return %arg0, %c0_i32, %c0_i32_0 : i32, i32, i32
  }
}

</mosaic_0001>

<bundles_post_ra>
// kernel: tpu_custom_call.1
= control target key start
LH: loop header
LB: loop body
LE: loop exit
PB: predicated region body
PF: predicated region fallthrough
CT: control target
= control target key end

     0   :  { %s954_s0 = inlined_call_operand.<no memory space> [shape: f32[1,1], index: 0, kind: input, shape index: {}]   ;;  %s955_s1 = inlined_call_operand.hbm [shape: f32[16,10], index: 1, kind: input, shape index: {}]   ;;  %s956_s2 = inlined_call_operand.hbm [shape: f32[16,10], index: 2, kind: input, shape index: {}]   ;;  %s957_s3 = inlined_call_operand.hbm [shape: f32[2,8,128], index: 3, kind: output, shape index: {}]  }
   0x1   :  { %8 = sst [smem:[#allocation3]] %s954_s0 }
   0x2   :  { %9 = vsyncpa [#allocation5], 0 }
   0x3   :  { %11 = vsyncpa [#allocation5 + $0x1], 0 }
   0x4   :  { %12 = vsyncpa [#allocation8], 0 }
   0x5   :  { %14 = vsyncpa [#allocation8 + $0x1], 0 }
   0x6   :  { %15 = vsyncpa [#allocation6], 0 }
   0x7   :  { %17 = vsyncpa [#allocation6 + $0x1], 0  ;;  %s716_s14 = smov 0   ;;  %s718_s15 = smov 0  }
   0x8   :  { %s720_s16 = smov 0   ;;  %s722_s17 = smov 0  }
   0x9   :  { %s724_s18 = smov 0   ;;  %s726_s19 = smov 0  }
   0xa LB: > { %s441_s0 = sadd.s32 4294967295, %s687_s19   ;;  %s442_s20 = sadd.s32 4294967294, %s687_s19   ;;  %s687_s19 = sphi %s726_s19, %s23_s19   ;;  %s683_s18 = sphi %s724_s18, %s977_s18   ;;  %s679_s17 = sphi %s722_s17, %s976_s17   ;;  %s675_s16 = sphi %s720_s16, %s975_s16   ;;  %s671_s15 = sphi %s718_s15, %s974_s15   ;;  %s667_s14 = sphi %s716_s14, %s973_s14  }
   0xb   : > { %s35_s21 = sadd.s32 1, %s683_s18  ;;  %s65_s22 = sadd.s32 1, %s675_s16 }
   0xc   : > { %p37_p0 = scmp.ge.s32.totalorder %s35_s21, 2  ;;  %p72_p1 = scmp.ne.s32.totalorder %s675_s16, %s671_s15 }
   0xd   : > { %p73_p2 = scmp.eq.s32.totalorder %s687_s19, 0  ;;  %p78_p3 = scmp.ne.s32.totalorder %s671_s15, %s667_s14 }
   0xe   : > { %s979_s21 = smov (%p37_p0, %s35_s21), 0  ;;  %p79_p5 = scmp.eq.s32.totalorder %s441_s0, 0 }
   0xf   : > { %p757_p4 = por %p73_p2, %p72_p1  ;;  %s62_s24 = ssub.s32 %s683_s18, %s979_s21 }
  0x10   : > { %p130_p6 = scmp.eq.s32.totalorder %s441_s0, 1  ;;  %p63_p7 = scmp.eq.s32.totalorder %s62_s24, 0 }
  0x11   : > { %p763_p8 = por %p79_p5, %p78_p3  ;;  %p136_p10 = scmp.eq.s32.totalorder %s442_s20, 1 }
  0x12   : > { %p767_p9 = por %p130_p6, %p72_p1  ;;  %p478_p13 = scmp.lt.s32.totalorder %s687_s19, 2 }
  0x13   : > { %s961_s25 = scalar_select %p763_p8, 1, 0 }
  0x14   : > { %s962_s26 = scalar_select %p767_p9, 1, 0 }
  0x15   : > { %s772_s27 = scalar_select %p63_p7, %s675_s16, %s65_s22  }
  0x16   : > { %p774_p11 = por %p136_p10, %p78_p3  ;;  %s781_s29 = sand.u32 1, %s675_s16  }
  0x17   : > { %s445_s30 = sshll.u32 %s781_s29, 3  ;;  %s446_s4 = sshll.u32 %s683_s18, 7 }
  0x18   : > { %s963_s28 = scalar_select %p774_p11, 1, 0 }
  0x19   : > { %s790_s7 = scalar_lea.hbm %s955_s1, %s446_s4  ;;  %s163_s8 = scalar_lea.vmem [#allocation4], %s445_s30 }
  0x1a   : > { %s171_s9 = sshll.u32 %s163_s8, 4  ;;  %p798_p0 = pnand %p478_p13, %p757_p4  ;;  %s794_s9 = int_to_ptr.vmem [resolvable:$true] %s171_s9 }
  0x1b   : > { %s160_s11 = scalar_lea.sflag [#allocation5], %s781_s29  ;;  %s541_s12 = scalar_lea.hbm %s790_s7, 128 }
  0x1c   : > { %p542_p3 = scmp.ne.s32.totalorder %s790_s7, %s541_s12  ;;  %p543_p5 = pneg %p798_p0 }
  0x1d   : > { %s546_s20 = scalar_lea.hbm %s955_s1, 256  ;;  %p547_p4 = scmp.lt.u32.totalorder %s790_s7, %s955_s1 }
  0x1e   : > { %p544_p6 = pnand %p543_p5, %p542_p3  ;;  %p548_p10 = scmp.lt.u32.totalorder %s546_s20, %s541_s12 }
  0x1f   : > { %p550_p12 = scmp.lt.u32.totalorder %s541_s12, %s790_s7 }
  0x20   : > { %p545_p7 = pneg %p544_p6  ;;  %p549_p13 = por %p548_p10, %p547_p4 }
  0x22   : > { %p551_p1 = por %p550_p12, %p549_p13 }
  0x24   : > { %p552_p2 = pnand %p551_p1, %p545_p7 }
  0x26   : > { %555 = shalt.err (!%p552_p2)
}
  0x27   : > { %s556_s24 = scalar_lea.vmem %s794_s9, 128  ;;  %s689_s5 = smov [#allocation4]  }
  0x28   : > { %p557_p3 = scmp.ne.s32.totalorder %s794_s9, %s556_s24  ;;  %s561_s6 = sshll.u32 %s689_s5, 4  ;;  %s562_s6 = int_to_ptr.vmem [resolvable:$false] %s561_s6 }
  0x29   : > { %s563_s8 = scalar_lea.vmem %s562_s6, 256  ;;  %p564_p9 = scmp.lt.s32.totalorder %s794_s9, %s562_s6 }
  0x2a   : > { %p559_p6 = pnand %p557_p3, %p543_p5  ;;  %p565_p4 = scmp.lt.s32.totalorder %s563_s8, %s556_s24 }
  0x2c   : > { %p560_p11 = pneg %p559_p6  ;;  %p566_p10 = por %p565_p4, %p564_p9 }
  0x2e   : > { %p567_p12 = pnand %p566_p10, %p560_p11 }
  0x30   : > { %570 = shalt.err (!%p567_p12)
}
  0x31   : > { %470 = dma.hbm_to_vmem [thread:$0]  (!%p798_p0), %s790_s7, 128, %s794_s9, %s160_s11  }
  0x32   : > { %p965_p1 = scmp.lt.s32.totalorder %s687_s19, 3  ;;  %p966_p2 = scmp.ge.s32.totalorder %s687_s19, 1 }
  0x33   : > { %s843_s20 = scalar_lea.hbm %s956_s2, %s446_s4  ;;  %s182_s22 = scalar_lea.vmem [#allocation7], %s445_s30 }
  0x34   : > { %p834_p7 = pnand %p966_p2, %p965_p1  ;;  %s190_s23 = sshll.u32 %s182_s22, 4  ;;  %s191_s23 = int_to_ptr.vmem [resolvable:$true] %s190_s23 }
  0x35   : > { %s179_s7 = scalar_lea.sflag [#allocation8], %s781_s29  ;;  %s571_s9 = scalar_lea.hbm %s843_s20, 128 }
  0x36   : > { %s967_s12 = scalar_select %p834_p7, 1, 0 }
  0x37   : > { %p572_p9 = scmp.ne.s32.totalorder %s843_s20, %s571_s9  ;;  %s576_s4 = scalar_lea.hbm %s956_s2, 256 }
  0x38   : > { %p577_p3 = scmp.lt.u32.totalorder %s843_s20, %s956_s2  ;;  %p578_p6 = scmp.lt.u32.totalorder %s576_s4, %s571_s9 }
  0x39   : > { %p574_p11 = pnand %p572_p9, %p543_p5  ;;  %p580_p10 = scmp.lt.u32.totalorder %s571_s9, %s843_s20 }
  0x3a   : > { %p579_p4 = por %p578_p6, %p577_p3 }
  0x3b   : > { %p575_p13 = pneg %p574_p11 }
  0x3c   : > { %p581_p12 = por %p580_p10, %p579_p4 }
  0x3e   : > { %p582_p1 = pnand %p581_p12, %p575_p13 }
  0x40   : > { %585 = shalt.err (!%p582_p1)
}
  0x41   : > { %s586_s29 = scalar_lea.vmem %s191_s23, 128  ;;  %s690_s30 = smov [#allocation7]  }
  0x42   : > { %p587_p2 = scmp.ne.s32.totalorder %s191_s23, %s586_s29  ;;  %s591_s8 = sshll.u32 %s690_s30, 4  ;;  %s592_s8 = int_to_ptr.vmem [resolvable:$false] %s591_s8 }
  0x43   : > { %s593_s13 = scalar_lea.vmem %s592_s8, 256  ;;  %p594_p8 = scmp.lt.s32.totalorder %s191_s23, %s592_s8 }
  0x44   : > { %p589_p9 = pnand %p587_p2, %p543_p5  ;;  %p595_p7 = scmp.lt.s32.totalorder %s593_s13, %s586_s29 }
  0x46   : > { %p590_p11 = pneg %p589_p9  ;;  %p596_p3 = por %p595_p7, %p594_p8 }
  0x48   : > { %p597_p6 = pnand %p596_p3, %p590_p11 }
  0x4a   : > { %600 = shalt.err (!%p597_p6)
}
  0x4b   : > { %473 = dma.hbm_to_vmem [thread:$0]  (!%p798_p0), %s843_s20, 128, %s191_s23, %s179_s7  }
  0x4c   : > { %p968_p13 = scmp.ne.s32.totalorder %s967_s12, 0 }
  0x4d   : > { %s870_s0 = sand.u32 (!%p968_p13), 1, %s671_s15   ;;  %p969_p8 = scmp.ne.s32.totalorder (!%p968_p13), %s961_s25, 0 }
  0x4e   : > { %199 = sbr.rel (%p968_p13) target bundleno = 870 (0x366), region = 32  ;;  %s873_s22 = sshll.u32 (!%p968_p13), %s870_s0, 3 }
  0x4f   : > { %s202_s9 = scalar_lea.sflag (!%p968_p13), [#allocation5], %s870_s0  ;;  %s205_s11 = scalar_lea.vmem (!%p968_p13), [#allocation4], %s873_s22 }
  0x55   : > { %654 = dma.done.wait (%p969_p8), %s202_s9, 128  }
  0x56   : > { %656 = vsyncadd (%p969_p8), %s202_s9, 4294967168  ;;  %s211_s10 = scalar_lea.sflag [#allocation8], %s870_s0  ;;  %s214_s12 = scalar_lea.vmem [#allocation7], %s873_s22 }
  0x57   : > { %658 = dma.done.wait (%p969_p8), %s211_s10, 128  }
  0x58   : > { %660 = vsyncadd (%p969_p8), %s211_s10, 4294967168  ;;  %s887_s20 = sld [smem:[#allocation3]]  ;;  %v254_v2 = vld [vmem:[%s214_s12] sm:$0xff]  ;;  %v272_v4 = vld [vmem:[%s205_s11] sm:$0xff]  ;;  %vm257_vm0 = vcmask 80896   ;;  %vm248_vm1 = vcmask 7168   ;;  %v314_v45 = vlaneseq }
  0x59   : > { %v691_v19 = vmov 0.0   ;;  %s454_s4 = sshll.u32 %s679_s17, 7  ;;  %s241_s5 = scalar_lea.vmem [#allocation9], %s873_s22 }
  0x5a   : > { %249 = vst.msk [vmem:[#allocation2] sm:$0xff] %vm248_vm1, %v691_v19  ;;  %v315_v46 = vshrl.u32 %v314_v45, 7  ;;  %v317_v47 = vand.u32 127, %v314_v45  ;;  %s338_s6 = sshll.u32 %s241_s5, 4  ;;  %s905_s13 = scalar_lea.hbm %s957_s3, %s454_s4  ;;  %s907_s6 = int_to_ptr.vmem [resolvable:$true] %s338_s6 }
  0x5b   : > { %s325_s9 = scalar_lea.sflag [#allocation6], %s870_s0  ;;  %s601_s11 = scalar_lea.vmem %s907_s6, 128 }
  0x5c   : > { %vm318_vm2 = vcmp.eq.s32.totalorder %v315_v46, 0  ;;  %vm319_vm3 = vcmp.eq.s32.totalorder %v317_v47, 0  ;;  %p602_p0 = scmp.ne.s32.totalorder %s907_s6, %s601_s11  ;;  %p970_p5 = scmp.ne.s32.totalorder %s962_s26, 0 }
  0x5d   : > { %vm320_vm4 = vmand %vm318_vm2, %vm319_vm3  ;;  %s692_s17 = smov [#allocation9]  }
  0x5e   : > { %v251_v0 = vstv %s887_s20  ;;  %s298_s25 = smul.f32 %s887_s20, %s887_s20  ;;  %p603_p7 = pnand %p602_p0, %p970_p5 }
  0x5f   : > { %529 = vrcp.f32 %v251_v0  ;;  %s605_s22 = sshll.u32 %s692_s17, 4  ;;  %s606_s22 = int_to_ptr.vmem [resolvable:$false] %s605_s22 }
  0x60   : > { %p604_p4 = pneg %p603_p7  ;;  %s607_s10 = scalar_lea.vmem %s606_s22, 256 }
  0x61   : > { %v291_v33 = vld [vmem:[#allocation2] sm:$0xff]  ;;  %p608_p10 = scmp.lt.s32.totalorder %s907_s6, %s606_s22  ;;  %p609_p12 = scmp.lt.s32.totalorder %s607_s10, %s601_s11 }
  0x63   : > { %p610_p1 = por %p609_p12, %p608_p10 }
  0x65   : > { %p611_p2 = pnand %p610_p1, %p604_p4 }
  0x69   : > { %v530_v1 = vpop.eup %529 }
  0x6a   : > { %457 = vpush %v530_v1 }
  0x9b   : > { %s458_s23 = spop %457 }
  0x9c   : > { %v255_v3 = vstv %s458_s23 }
  0x9d   : > { %v256_v5 = vmul.f32 %v255_v3, %v254_v2  ;;  %v273_v6 = vmul.f32 %v272_v4, %v255_v3 }
  0x9f   : > { %v258_v7 = vsel %vm257_vm0, %v256_v5, -inf  ;;  %v274_v8 = vsel %vm257_vm0, %v273_v6, -inf }
  0xa0   : > { %259 = vmax.xlane.f32.xlu0 %v258_v7 }
  0xa4   : > { %275 = vmax.xlane.f32.xlu0 %v274_v8 }
 0x12d   : > { %v260_v9 = vpop.xlane.xlu0 %259 }
 0x12e   : > { %v261_v10 = vsub.f32 %v256_v5, %v260_v9 }
 0x130   : > { %v262_v11 = vmul.f32 1.442695, %v261_v10 }
 0x131   : > { %v276_v12 = vpop.xlane.xlu0 %275 }
 0x132   : > { %531 = vpow2.f32 %v262_v11  ;;  %v277_v13 = vsub.f32 %v273_v6, %v276_v12 }
 0x134   : > { %v278_v14 = vmul.f32 1.442695, %v277_v13 }
 0x136   : > { %533 = vpow2.f32 %v278_v14 }
 0x13c   : > { %v532_v15 = vpop.eup %531 }
 0x13d   : > { %v264_v16 = vsel %vm257_vm0, %v532_v15, 0.0 }
 0x13e   : > { %265 = vadd.xlane.f32.xlu1 %v264_v16 }
 0x140   : > { %v534_v17 = vpop.eup %533 }
 0x141   : > { %v280_v18 = vsel %vm257_vm0, %v534_v17, 0.0 }
 0x142   : > { %281 = vadd.xlane.f32.xlu1 %v280_v18 }
 0x1cb   : > { %v266_v20 = vpop.xlane.xlu1 %265 }
 0x1cc   : > { %535 = vrcp.f32 %v266_v20 }
 0x1cf   : > { %v282_v21 = vpop.xlane.xlu1 %281 }
 0x1d0   : > { %537 = vlog2.f32 %v282_v21 }
 0x1d6   : > { %v536_v22 = vpop.eup %535 }
 0x1d7   : > { %v268_v23 = vmul.f32 %v536_v22, %v532_v15 }
 0x1d9   : > { %v269_v24 = vadd.f32 1e-07, %v268_v23 }
 0x1da   : > { %v538_v25 = vpop.eup %537 }
 0x1db   : > { %539 = vlog2.f32 %v269_v24  ;;  %v284_v26 = vmul.f32 0.6931472, %v538_v25 }
 0x1dd   : > { %v285_v28 = vsub.f32 %v277_v13, %v284_v26 }
 0x1e5   : > { %v540_v27 = vpop.eup %539 }
 0x1e6   : > { %v271_v29 = vmul.f32 0.6931472, %v540_v27 }
 0x1e8   : > { %v286_v30 = vsub.f32 %v271_v29, %v285_v28 }
 0x1ea   : > { %v287_v31 = vmul.f32 %v286_v30, %v269_v24 }
 0x1ec   : > { %v288_v32 = vsel %vm257_vm0, %v287_v31, 0.0 }
 0x1ed   : > { %289 = vadd.xlane.f32.xlu0 %v288_v32 }
 0x27a   : > { %v290_v34 = vpop.xlane.xlu0 %289 }
 0x27b   : > { %v292_v35 = vadd.f32 %v291_v33, %v290_v34 }
 0x27d   : > { %294 = vst.msk [vmem:[#allocation2] sm:$0xff] %vm248_vm1, %v292_v35 }
 0x284   : > { %v299_v36 = vld [vmem:[#allocation2] sm:$0xff] }
 0x285   : > { %v300_v37 = vsel %vm248_vm1, %v299_v36, 0.0 }
 0x286   : > { %301 = vadd.xlane.f32.xlu1 %v300_v37 }
 0x313   : > { %v302_v38 = vpop.xlane.xlu1 %301 }
 0x314   : > { %v303_v39 = vrot.slane %v302_v38, 4 }
 0x316   : > { %v304_v40 = vadd.f32 %v303_v39, %v302_v38 }
 0x318   : > { %v305_v41 = vrot.slane %v304_v40, 2 }
 0x31a   : > { %v306_v42 = vadd.f32 %v305_v41, %v304_v40 }
 0x31c   : > { %v307_v43 = vrot.slane %v306_v42, 1 }
 0x31e   : > { %v308_v44 = vadd.f32 %v307_v43, %v306_v42 }
 0x320   : > { %459 = vpush %v308_v44 }
 0x351   : > { %s460_s7 = spop %459 }
 0x352   : > { %s310_s24 = smul.f32 %s460_s7, %s298_s25 }
 0x354   : > { %s313_s29 = smul.f32 0.0625, %s310_s24 }
 0x356   : > { %v321_v48 = vstv %s313_s29 }
 0x357   : > { %v322_v49 = vsel %vm320_vm4, %v321_v48, 0.0 }
 0x358   : > { %323 = vst [vmem:[%s241_s5] sm:$0xff] %v322_v49 }
 0x359   : > { %614 = shalt.err (!%p611_p2)
}
 0x35a   : > { %s615_s0 = scalar_lea.hbm %s905_s13, 128  ;;  %s619_s23 = scalar_lea.hbm %s957_s3, 256 }
 0x35b   : > { %p616_p9 = scmp.ne.s32.totalorder %s905_s13, %s615_s0  ;;  %p620_p6 = scmp.lt.u32.totalorder %s905_s13, %s957_s3 }
 0x35c   : > { %p621_p13 = scmp.lt.u32.totalorder %s619_s23, %s615_s0  ;;  %p623_p0 = scmp.lt.u32.totalorder %s615_s0, %s905_s13 }
 0x35d   : > { %p617_p11 = pnand %p616_p9, %p970_p5 }
 0x35e   : > { %p622_p8 = por %p621_p13, %p620_p6 }
 0x35f   : > { %p618_p3 = pneg %p617_p11 }
 0x360   : > { %p624_p7 = por %p623_p0, %p622_p8 }
 0x362   : > { %p625_p4 = pnand %p624_p7, %p618_p3 }
 0x364   : > { %628 = shalt.err (!%p625_p4)
}
 0x365   : > { %465 = dma.vmem_to_hbm [thread:$0]  (%p970_p5), %s907_s6, 128, %s905_s13, %s325_s9  }
 0x366 PF: > { %s350_s24 = sand.u32 1, %s667_s14   ;;  %p971_p10 = scmp.ne.s32.totalorder %s963_s28, 0 }
 0x367   : > { %p972_p12 = scmp.ge.s32.totalorder %s687_s19, 2  ;;  %s351_s4 = scalar_lea.sflag [#allocation6], %s350_s24 }
 0x369   : > { %p475_p1 = pnand %p972_p12, %p971_p10 }
 0x36b   : > { %662 = dma.done.wait (!%p475_p1), %s351_s4, 128  }
 0x36c   : > { %664 = vsyncadd (!%p475_p1), %s351_s4, 4294967168  ;;  %s23_s19 = sadd.s32 1, %s687_s19   ;;  %s973_s14 = smov %s671_s15 }
 0x36d   : > { %p20_p2 = scmp.ge.s32.totalorder %s23_s19, 4   ;;  %s974_s15 = smov %s675_s16 }
 0x36e   : > { %s975_s16 = smov %s772_s27  ;;  %s976_s17 = smov %s683_s18 }
 0x36f   : > { %s977_s18 = smov %s979_s21  ;;  %22 = sbr.rel (!%p20_p2) target bundleno = 10 (0xa), region = 98 }
 0x376   :  { %356 = vsyncpa [#allocation5], 1 }
 0x377   :  { %358 = vsyncpa [#allocation5 + $0x1], 1 }
 0x378   :  { %359 = vsyncpa [#allocation8], 1 }
 0x379   :  { %361 = vsyncpa [#allocation8 + $0x1], 1 }
 0x37a   :  { %362 = vsyncpa [#allocation6], 1 }
 0x37b   :  { %364 = vsyncpa [#allocation6 + $0x1], 1 }

</bundles_post_ra>
